<compile_context>
chip_gen: v5e
topology: v5e:2x2
jax: 0.10.0
libtpu: 0.0.40
codegen_flags: <defaults>
</compile_context>

<pallas_src>
import functools

import jax
import jax.numpy as jnp
from jax.experimental import pallas as pl
from jax.experimental.pallas import tpu as pltpu

COMPRESS_RATIO = 2
BN_EPS = 1e-5


def _round_up(x, m):
    return ((x + m - 1) // m) * m


def _pick_group(hout, max_depth=256):
    # Group h-rows so the conv-matmul contraction depth (9*g) stays near the MXU
    # depth instead of growing (and wasting MACs) linearly with Hout.
    g = hout
    while 9 * g > max_depth and g % 2 == 0:
        g //= 2
    return g


# ----------------------------------------------------------------------------
# Fused kernel: conv(+folded BN)+ReLU -> fc decoder (Linear+Tanh) -> classifier
# ----------------------------------------------------------------------------
def _fused_ocr_kernel(p_ref, wg_ref, cb_ref, w1_ref, b1_ref, w2_ref, b2_ref,
                      o_ref, h_ref, *, n_groups, gk):
    # NOTE: h_ref (decoder activations) is computed once per row-tile i and
    # reused for every classifier tile j.  This is only correct because j is the
    # innermost, sequentially iterated ("arbitrary") grid axis — do not reorder
    # the grid tuple.
    @pl.when(pl.program_id(1) == 0)
    def _():
        parts = []
        for G in range(n_groups):            # static loop; same weight per group
            fg = jnp.dot(p_ref[:, G * gk:(G + 1) * gk], wg_ref[...],
                         preferred_element_type=jnp.float32)
            fg = jnp.maximum(fg + cb_ref[...], 0.0)   # folded conv-bias+BN, ReLU
            parts.append(fg.astype(jnp.bfloat16))
        feat = parts[0] if n_groups == 1 else jnp.concatenate(parts, axis=1)
        h = jnp.dot(feat, w1_ref[...], preferred_element_type=jnp.float32)
        # fc decoder (dropout = identity in eval); store bf16 once (tanh bounded)
        h_ref[...] = jnp.tanh(h + b1_ref[...]).astype(jnp.bfloat16)

    # every j: one lane-dense classifier tile, f32 logits (API contract)
    o_ref[...] = (jnp.dot(h_ref[...], w2_ref[...],
                          preferred_element_type=jnp.float32) + b2_ref[...])
    # TODO(synk): for the decode-only path, fuse a running per-row max/argmax
    # across j so only [M] ids leave HBM instead of the full f32 logits slab.


def fused_ocr_head(pbig, wg, cb, w1, b1, w2, b2, *, n_groups, tm_max=1024):
    M, K1 = pbig.shape            # rows = B*Wout, K1 = 9*Hout
    gk, gf = wg.shape             # 9*g, C*g (shared per-group conv weight)
    F, HID = w1.shape             # F = C*Hout
    Npad = w2.shape[1]
    assert K1 == n_groups * gk and F == n_groups * gf and Npad % 128 == 0

    # v7x: pick tm ~ ceil(M/2) so the "parallel" i axis yields >=2 grid steps and
    # both TensorCores engage; harmless on single-TC v5e/v6e.  tm_max=1024 keeps
    # big-M workloads in large tiles (VMEM is barely touched at these widths).
    tm = min(tm_max, max(16, _round_up(pl.cdiv(M, 2), 16)))
    m_pad = _round_up(M, tm)
    if m_pad != M:
        pbig = jnp.pad(pbig, ((0, m_pad - M), (0, 0)))
    # v5e note: with f32 stores a 256-wide output tile is pure store pressure;
    # keep 256 only when Npad allows it, otherwise 128.
    tn = 256 if Npad % 256 == 0 else 128
    grid = (m_pad // tm, Npad // tn)

    kernel = functools.partial(_fused_ocr_kernel, n_groups=n_groups, gk=gk)

    flops = 2 * m_pad * (n_groups * gk * gf + F * HID + HID * Npad)
    bytes_accessed = (pbig.size * 2 + wg.size * 2 + w1.size * 2 + w2.size * 2
                      + (cb.size + b1.size + b2.size) * 4 + m_pad * Npad * 4)

    # NOTE: the constant-index operands (wg, cb, w1, b1) could be single-buffered
    # (pipeline_mode) to recover VMEM headroom on v7x if F/HID are scaled up.
    return pl.pallas_call(
        kernel,
        out_shape=jax.ShapeDtypeStruct((m_pad, Npad), jnp.float32),
        grid_spec=pltpu.PrefetchScalarGridSpec(
            num_scalar_prefetch=0,
            grid=grid,
            in_specs=[
                pl.BlockSpec((tm, K1), lambda i, j: (i, 0)),   # im2col rows
                pl.BlockSpec((gk, gf), lambda i, j: (0, 0)),   # shared group weight
                pl.BlockSpec((1, gf), lambda i, j: (0, 0)),    # folded bias/BN shift
                pl.BlockSpec((F, HID), lambda i, j: (0, 0)),   # decoder Linear
                pl.BlockSpec((1, HID), lambda i, j: (0, 0)),
                pl.BlockSpec((HID, tn), lambda i, j: (0, j)),  # classifier tile
                pl.BlockSpec((1, tn), lambda i, j: (0, j)),
            ],
            out_specs=pl.BlockSpec((tm, tn), lambda i, j: (i, j)),
            scratch_shapes=[pltpu.VMEM((tm, HID), jnp.bfloat16)],
        ),
        compiler_params=pltpu.CompilerParams(
            dimension_semantics=("parallel", "arbitrary"),
            vmem_limit_bytes=32 * 1024 * 1024,
        ),
        cost_estimate=pl.CostEstimate(
            flops=int(flops),
            transcendentals=int(m_pad * HID),
            bytes_accessed=int(bytes_accessed)),
    )(pbig, wg, cb, w1, b1, w2, b2)


# ----------------------------------------------------------------------------
# One-time parameter prep (hoisted off the per-call forward path)
# ----------------------------------------------------------------------------
def prepare_ocr_params(params, H):
    C = params["conv_w"].shape[0]
    Hout = H // COMPRESS_RATIO
    HID = params["w1"].shape[1]
    n_classes = params["w2"].shape[1]
    g = _pick_group(Hout)

    # Fold conv bias + BatchNorm(eval) into the conv weights / one shift row.
    scale = params["bn_gamma"] * jax.lax.rsqrt(params["bn_var"] + BN_EPS)
    shift = params["bn_beta"] - params["bn_mean"] * scale
    wfold = params["conv_w"].reshape(C, 9).T * scale[None, :]        # [9, C]
    bfold = params["conv_b"] * scale + shift                         # [C]

    # Block-diagonal over the g h-rows inside a group: wg[h*9+k, h*C+c]=wfold[k,c].
    # The SAME weight serves every group, so no Hout^2 blowup.
    eye_g = jnp.eye(g, dtype=jnp.float32)
    wg = jnp.einsum("kc,hg->hkgc", wfold, eye_g).reshape(9 * g, C * g)
    wg = wg.astype(jnp.bfloat16)
    cb = jnp.tile(bfold, (g,))[None, :]                               # [1, C*g]

    # Feature slab columns are h-major (h*C + c); permute w1 rows (c*Hout + h in
    # the PyTorch layout) to match — free at prep time.
    w1p = params["w1"].reshape(C, Hout, HID).transpose(1, 0, 2).reshape(Hout * C, HID)
    w1p = w1p.astype(jnp.bfloat16)
    b1 = params["b1"][None, :]

    # Pad classifier to a lane-dense width; padded bias = -1e9 so argmax/CTC can
    # run directly on the padded slab if the slice is ever skipped.
    npad = 128 if n_classes <= 128 else _round_up(n_classes, 256)
    w2p = jnp.pad(params["w2"], ((0, 0), (0, npad - n_classes))).astype(jnp.bfloat16)
    b2p = jnp.pad(params["b2"], (0, npad - n_classes), constant_values=-1e9)[None, :]

    return {"wg": wg, "cb": cb, "w1": w1p, "b1": b1, "w2": w2p, "b2": b2p}


# ----------------------------------------------------------------------------
# OcrModel.forward (inference: target=None, candidates=None, return_logits=True)
# ----------------------------------------------------------------------------
@functools.partial(jax.jit, static_argnames=("n_classes",))
def ocr_forward(x, input_lengths, prep, *, n_classes):
    B, _, H, W = x.shape
    Hout, Wout = H // COMPRESS_RATIO, W // COMPRESS_RATIO
    gk, gf = prep["wg"].shape
    g = gk // 9
    C = gf // g
    F = prep["w1"].shape[0]
    assert F == C * Hout and Hout % g == 0
    n_groups = Hout // g

    # im2col taps directly in the FINAL layout: rows (b, wout), cols (hout*9 + k).
    # One small transpose of the padded input replaces the previous materialized
    # transpose of the full 9x im2col buffer.
    xp = jnp.pad(x[:, 0], ((0, 0), (1, 1), (1, 1)))          # [B, H+2, W+2]
    xpt = jnp.transpose(xp, (0, 2, 1))                        # [B, W+2, H+2] (tiny)
    taps = [xpt[:, kw:kw + 2 * Wout:2, kh:kh + 2 * Hout:2]
            for kh in range(3) for kw in range(3)]            # 9 x [B, Wout, Hout]
    pbig = jnp.stack(taps, axis=-1).reshape(B * Wout, Hout * 9).astype(jnp.bfloat16)
    # TODO(synk): form the taps fully in-kernel from halo-padded input rows
    # (sublane/lane-strided VMEM gathers) to drop the im2col HBM buffer entirely.

    logits_full = fused_ocr_head(pbig, prep["wg"], prep["cb"], prep["w1"],
                                 prep["b1"], prep["w2"], prep["b2"],
                                 n_groups=n_groups)
    logits = logits_full[: B * Wout, :n_classes].reshape(B, Wout, n_classes)

    # candidates=None -> _mask_by_candidates is identity.
    # TODO(synk): LSTM/GRU decoder variant (pack_padded_sequence) not implemented.
    new_lengths = input_lengths // COMPRESS_RATIO
    return logits, new_lengths


# TODO(synk): CTC loss (F.ctc_loss) for training mode is not implemented.
def ctc_greedy_decode(logits, lengths, vocab):
    blank = len(vocab)
    ids = jax.device_get(jnp.argmax(logits, axis=-1))
    lengths = jax.device_get(lengths)
    preds = []
    for b in range(ids.shape[0]):
        seq = ids[b, : int(lengths[b])]
        out, prev = [], -1
        for t in seq:
            t = int(t)
            if t != prev and t != blank:
                out.append(vocab[t])
            prev = t
        preds.append("".join(out))
    return preds


# pure-JAX f32 reference of the same forward (for a tolerance check)
def _reference_forward(x, params):
    conv = jax.lax.conv_general_dilated(
        x, params["conv_w"], window_strides=(2, 2), padding=((1, 1), (1, 1)),
        dimension_numbers=("NCHW", "OIHW", "NCHW"))
    conv = conv + params["conv_b"][None, :, None, None]
    scale = params["bn_gamma"] / jnp.sqrt(params["bn_var"] + BN_EPS)
    shift = params["bn_beta"] - params["bn_mean"] * scale
    feat = jnp.maximum(conv * scale[None, :, None, None]
                       + shift[None, :, None, None], 0.0)
    B = x.shape[0]
    c, h, w = feat.shape[1], feat.shape[2], feat.shape[3]
    seq = jnp.transpose(feat.reshape(B, c * h, w), (0, 2, 1))
    hid = jnp.tanh(seq @ params["w1"] + params["b1"])
    return hid @ params["w2"] + params["b2"]


if __name__ == "__main__":
    key = jax.random.PRNGKey(0)
    k_conv, k_w1, k_w2, k_x = jax.random.split(key, 4)

    # small shapes consistent with OcrModel: x is [B, 1, H, W]
    B, H, W = 2, 16, 32
    C, HIDDEN = 32, 128
    vocab = list("abcdefghijklmnopqrstuvwxyz")
    n_classes = len(vocab) + 1
    feat_dim = C * (H // 2)                       # c*h fed to the decoder (= 256)

    params = {
        # Conv2d(1, C, 3, stride=2, pad=1), kaiming_normal_ fan_out, bias zeroed
        "conv_w": jax.random.normal(k_conv, (C, 1, 3, 3), jnp.float32)
                  * jnp.sqrt(2.0 / (C * 9)),
        "conv_b": jnp.zeros((C,), jnp.float32),
        # BatchNorm2d(C): weight=1, bias=0, eval running stats
        "bn_gamma": jnp.ones((C,), jnp.float32),
        "bn_beta": jnp.zeros((C,), jnp.float32),
        "bn_mean": jnp.zeros((C,), jnp.float32),
        "bn_var": jnp.ones((C,), jnp.float32),
        # fc decoder: Linear(feat_dim, HIDDEN) (+ Tanh)
        "w1": jax.random.normal(k_w1, (feat_dim, HIDDEN), jnp.float32)
              / jnp.sqrt(feat_dim),
        "b1": jnp.zeros((HIDDEN,), jnp.float32),
        # classifier: Linear(HIDDEN, len(vocab)+1)
        "w2": jax.random.normal(k_w2, (HIDDEN, n_classes), jnp.float32)
              / jnp.sqrt(HIDDEN),
        "b2": jnp.zeros((n_classes,), jnp.float32),
    }

    x = jax.random.normal(k_x, (B, 1, H, W), jnp.float32)
    input_lengths = jnp.array([32, 24], dtype=jnp.int32)

    # one-time weight folding / padding (off the per-call critical path)
    prep = prepare_ocr_params(params, H)

    logits, out_lengths = ocr_forward(x, input_lengths, prep, n_classes=n_classes)
    logits = jax.block_until_ready(logits)

    # bf16-MXU tolerance check against the f32 reference
    ref = _reference_forward(x, params)
    max_err = float(jnp.max(jnp.abs(logits - ref)))
    assert max_err < 5e-2, f"max abs error {max_err}"

    preds = ctc_greedy_decode(logits, out_lengths, vocab)
    assert logits.shape == (B, W // 2, n_classes)
    assert len(preds) == B
    print("KERNEL_OK")
</pallas_src>

<mosaic_0001>
module attributes {stable_mosaic.version = 11 : i64} {
  func.func @_fused_ocr_kernel(%arg0: i32, %arg1: i32, %arg2: memref<16x72xbf16, #tpu.memory_space<vmem>>, %arg3: memref<72x256xbf16, #tpu.memory_space<vmem>>, %arg4: memref<1x256xf32, #tpu.memory_space<vmem>>, %arg5: memref<256x128xbf16, #tpu.memory_space<vmem>>, %arg6: memref<1x128xf32, #tpu.memory_space<vmem>>, %arg7: memref<128x128xbf16, #tpu.memory_space<vmem>>, %arg8: memref<1x128xf32, #tpu.memory_space<vmem>>, %arg9: memref<16x128xf32, #tpu.memory_space<vmem>>, %arg10: memref<16x128xbf16, #tpu.memory_space<vmem>>) attributes {dimension_semantics = [#tpu.dimension_semantics<parallel>, #tpu.dimension_semantics<arbitrary>], iteration_bounds = array<i64: 2, 1>, scalar_prefetch = 0 : i64, scratch_operands = 1 : i64, tpu.core_type = #tpu.core_type<tc>, window_params = [{transform_indices = @transform_0, window_bounds = array<i64: 16, 72>}, {pipeline_mode = #tpu.pipeline_mode<synchronous>, transform_indices = @transform_1, window_bounds = array<i64: 72, 256>}, {pipeline_mode = #tpu.pipeline_mode<synchronous>, transform_indices = @transform_2, window_bounds = array<i64: 1, 256>}, {pipeline_mode = #tpu.pipeline_mode<synchronous>, transform_indices = @transform_3, window_bounds = array<i64: 256, 128>}, {pipeline_mode = #tpu.pipeline_mode<synchronous>, transform_indices = @transform_4, window_bounds = array<i64: 1, 128>}, {transform_indices = @transform_5, window_bounds = array<i64: 128, 128>}, {transform_indices = @transform_6, window_bounds = array<i64: 1, 128>}, {transform_indices = @transform_7, window_bounds = array<i64: 16, 128>}]} {
    %c0_i32 = arith.constant 0 : i32
    %0 = arith.cmpi eq, %arg1, %c0_i32 : i32
    %1 = arith.extui %0 : i1 to i32
    %c0_i32_0 = arith.constant 0 : i32
    %2 = arith.cmpi ne, %1, %c0_i32_0 : i32
    scf.if %2 {
      %c0_8 = arith.constant 0 : index
      %c0_9 = arith.constant 0 : index
      %10 = vector.load %arg2[%c0_8, %c0_9] : memref<16x72xbf16, #tpu.memory_space<vmem>>, vector<16x72xbf16>
      %c0_10 = arith.constant 0 : index
      %c0_11 = arith.constant 0 : index
      %11 = vector.load %arg3[%c0_10, %c0_11] : memref<72x256xbf16, #tpu.memory_space<vmem>>, vector<72x256xbf16>
      %cst_12 = arith.constant dense<0.000000e+00> : vector<16x256xf32>
      %12 = tpu.matmul %10, %11, %cst_12 {dimension_numbers = #tpu.dot_dimension_numbers<[1], [0], [0], [1], [0, 0, 1, 1], [], []>} : vector<16x72xbf16>, vector<72x256xbf16>, vector<16x256xf32> -> vector<16x256xf32>
      %c0_13 = arith.constant 0 : index
      %c0_14 = arith.constant 0 : index
      %13 = vector.load %arg4[%c0_13, %c0_14] : memref<1x256xf32, #tpu.memory_space<vmem>>, vector<1x256xf32>
      %14 = vector.broadcast %13 : vector<1x256xf32> to vector<16x256xf32>
      %15 = arith.addf %12, %14 : vector<16x256xf32>
      %cst_15 = arith.constant 0.000000e+00 : f32
      %16 = vector.broadcast %cst_15 : f32 to vector<16x256xf32>
      %17 = arith.maximumf %15, %16 : vector<16x256xf32>
      %18 = arith.truncf %17 : vector<16x256xf32> to vector<16x256xbf16>
      %c0_16 = arith.constant 0 : index
      %c0_17 = arith.constant 0 : index
      %19 = vector.load %arg5[%c0_16, %c0_17] : memref<256x128xbf16, #tpu.memory_space<vmem>>, vector<256x128xbf16>
      %cst_18 = arith.constant dense<0.000000e+00> : vector<16x128xf32>
      %20 = tpu.matmul %18, %19, %cst_18 {dimension_numbers = #tpu.dot_dimension_numbers<[1], [0], [0], [1], [0, 0, 1, 1], [], []>} : vector<16x256xbf16>, vector<256x128xbf16>, vector<16x128xf32> -> vector<16x128xf32>
      %c0_19 = arith.constant 0 : index
      %c0_20 = arith.constant 0 : index
      %21 = vector.load %arg6[%c0_19, %c0_20] : memref<1x128xf32, #tpu.memory_space<vmem>>, vector<1x128xf32>
      %22 = vector.broadcast %21 : vector<1x128xf32> to vector<16x128xf32>
      %23 = arith.addf %20, %22 : vector<16x128xf32>
      %24 = math.tanh %23 : vector<16x128xf32>
      %25 = arith.truncf %24 : vector<16x128xf32> to vector<16x128xbf16>
      %c0_21 = arith.constant 0 : index
      %c0_22 = arith.constant 0 : index
      %26 = vector.load %arg10[%c0_21, %c0_22] : memref<16x128xbf16, #tpu.memory_space<vmem>>, vector<16x128xbf16>
      tpu.vector_store %arg10[%c0_21, %c0_22], %25 {strides = array<i32>} : memref<16x128xbf16, #tpu.memory_space<vmem>>, vector<16x128xbf16>,
    } else {
    }
    %c0 = arith.constant 0 : index
    %c0_1 = arith.constant 0 : index
    %3 = vector.load %arg10[%c0, %c0_1] : memref<16x128xbf16, #tpu.memory_space<vmem>>, vector<16x128xbf16>
    %c0_2 = arith.constant 0 : index
    %c0_3 = arith.constant 0 : index
    %4 = vector.load %arg7[%c0_2, %c0_3] : memref<128x128xbf16, #tpu.memory_space<vmem>>, vector<128x128xbf16>
    %cst = arith.constant dense<0.000000e+00> : vector<16x128xf32>
    %5 = tpu.matmul %3, %4, %cst {dimension_numbers = #tpu.dot_dimension_numbers<[1], [0], [0], [1], [0, 0, 1, 1], [], []>} : vector<16x128xbf16>, vector<128x128xbf16>, vector<16x128xf32> -> vector<16x128xf32>
    %c0_4 = arith.constant 0 : index
    %c0_5 = arith.constant 0 : index
    %6 = vector.load %arg8[%c0_4, %c0_5] : memref<1x128xf32, #tpu.memory_space<vmem>>, vector<1x128xf32>
    %7 = vector.broadcast %6 : vector<1x128xf32> to vector<16x128xf32>
    %8 = arith.addf %5, %7 : vector<16x128xf32>
    %c0_6 = arith.constant 0 : index
    %c0_7 = arith.constant 0 : index
    %9 = vector.load %arg9[%c0_6, %c0_7] : memref<16x128xf32, #tpu.memory_space<vmem>>, vector<16x128xf32>
    tpu.vector_store %arg9[%c0_6, %c0_7], %8 {strides = array<i32>} : memref<16x128xf32, #tpu.memory_space<vmem>>, vector<16x128xf32>,
    return
  }
  func.func @transform_0(%arg0: i32, %arg1: i32) -> (i32, i32) {
    %c0_i32 = arith.constant 0 : i32
    %c0_i32_0 = arith.constant 0 : i32
    return %arg0, %c0_i32 : i32, i32
  }
  func.func @transform_1(%arg0: i32, %arg1: i32) -> (i32, i32) {
    %c0_i32 = arith.constant 0 : i32
    %c0_i32_0 = arith.constant 0 : i32
    %c0_i32_1 = arith.constant 0 : i32
    return %c0_i32, %c0_i32_0 : i32, i32
  }
  func.func @transform_2(%arg0: i32, %arg1: i32) -> (i32, i32) {
    %c0_i32 = arith.constant 0 : i32
    %c0_i32_0 = arith.constant 0 : i32
    %c0_i32_1 = arith.constant 0 : i32
    return %c0_i32, %c0_i32_0 : i32, i32
  }
  func.func @transform_3(%arg0: i32, %arg1: i32) -> (i32, i32) {
    %c0_i32 = arith.constant 0 : i32
    %c0_i32_0 = arith.constant 0 : i32
    %c0_i32_1 = arith.constant 0 : i32
    return %c0_i32, %c0_i32_0 : i32, i32
  }
  func.func @transform_4(%arg0: i32, %arg1: i32) -> (i32, i32) {
    %c0_i32 = arith.constant 0 : i32
    %c0_i32_0 = arith.constant 0 : i32
    %c0_i32_1 = arith.constant 0 : i32
    return %c0_i32, %c0_i32_0 : i32, i32
  }
  func.func @transform_5(%arg0: i32, %arg1: i32) -> (i32, i32) {
    %c0_i32 = arith.constant 0 : i32
    %c0_i32_0 = arith.constant 0 : i32
    return %c0_i32, %arg1 : i32, i32
  }
  func.func @transform_6(%arg0: i32, %arg1: i32) -> (i32, i32) {
    %c0_i32 = arith.constant 0 : i32
    %c0_i32_0 = arith.constant 0 : i32
    return %c0_i32, %arg1 : i32, i32
  }
  func.func @transform_7(%arg0: i32, %arg1: i32) -> (i32, i32) {
    %c0_i32 = arith.constant 0 : i32
    return %arg0, %arg1 : i32, i32
  }
}

</mosaic_0001>

<bundles_post_ra>
// kernel: ocr_forward.1
= control target key start
LH: loop header
LB: loop body
LE: loop exit
PB: predicated region body
PF: predicated region fallthrough
CT: control target
= control target key end

     0   :  { %12 = vsyncpa [#allocation4], 0  ;;  %s1426_s0 = inlined_call_operand.vmem [shape: bf16[32,72], index: 0, kind: input, shape index: {}]   ;;  %s1427_s1 = inlined_call_operand.vmem [shape: bf16[72,256], index: 1, kind: input, shape index: {}]   ;;  %s1428_s2 = inlined_call_operand.vmem [shape: f32[1,256], index: 2, kind: input, shape index: {}]   ;;  %s1429_s3 = inlined_call_operand.vmem [shape: bf16[256,128], index: 3, kind: input, shape index: {}]   ;;  %s1430_s4 = inlined_call_operand.vmem [shape: f32[1,128], index: 4, kind: input, shape index: {}]   ;;  %s1431_s5 = inlined_call_operand.vmem [shape: bf16[128,128], index: 5, kind: input, shape index: {}]   ;;  %s1432_s6 = inlined_call_operand.vmem [shape: f32[1,128], index: 6, kind: input, shape index: {}]   ;;  %s1433_s7 = inlined_call_operand.hbm [shape: f32[32,128], index: 7, kind: output, shape index: {}]  }
   0x1   :  { %14 = vsyncpa [#allocation4 + $0x1], 0  ;;  %s1194_s24 = smov 0   ;;  %s1196_s25 = smov 0  }
   0x2   :  { %s1198_s26 = smov 0   ;;  %s1200_s27 = smov 0  }
   0x3   :  { %s1202_s28 = smov 0   ;;  %s1204_s29 = smov 0  }
   0x4 LB: > { %s816_s30 = sadd.s32 4294967295, %s1150_s29   ;;  %s817_s8 = sadd.s32 4294967294, %s1150_s29   ;;  %s1150_s29 = sphi %s1204_s29, %s20_s29   ;;  %s1146_s28 = sphi %s1202_s28, %s1440_s28   ;;  %s1142_s27 = sphi %s1200_s27, %s1439_s27   ;;  %s1138_s26 = sphi %s1198_s26, %s1438_s26   ;;  %s1134_s25 = sphi %s1196_s25, %s1437_s25   ;;  %s1130_s24 = sphi %s1194_s24, %s1436_s24  }
   0x5   : > { %s32_s9 = sadd.s32 1, %s1146_s28  ;;  %s203_s10 = sadd.s32 1, %s1138_s26 }
   0x6   : > { %p34_p0 = scmp.ge.s32.totalorder %s32_s9, 2  ;;  %p213_p1 = scmp.ne.s32.totalorder %s1138_s26, %s1134_s25 }
   0x7   : > { %p214_p2 = scmp.eq.s32.totalorder %s816_s30, 1  ;;  %p219_p3 = scmp.ne.s32.totalorder %s1134_s25, %s1130_s24 }
   0x8   : > { %s1442_s9 = smov (%p34_p0, %s32_s9), 0  ;;  %p220_p5 = scmp.eq.s32.totalorder %s817_s8, 1 }
   0x9   : > { %p1234_p4 = por %p214_p2, %p213_p1  ;;  %s198_s12 = ssub.s32 %s1146_s28, %s1442_s9 }
   0xa   : > { %p822_p6 = scmp.ge.s32.totalorder %s1150_s29, 1  ;;  %p201_p7 = scmp.eq.s32.totalorder %s198_s12, 0 }
   0xb   : > { %p1241_p8 = por %p220_p5, %p219_p3  ;;  %p272_p9 = scmp.lt.s32.totalorder %s1150_s29, 3 }
   0xc   : > { %s1247_s14 = scalar_select %p201_p7, %s1138_s26, %s203_s10  }
   0xd   : > { %p273_p10 = pnand %p822_p6, %p272_p9 }
   0xe   : > { %s824_s21 = sshll.u32 (!%p273_p10), %s1142_s27, 1  ;;  %s308_s16 = sand.u32 (!%p273_p10), 1, %s1134_s25  }
   0xf   : > { %276 = sbr.rel (%p273_p10) target bundleno = 504 (0x1f8), region = 48  ;;  %p312_p11 = scmp.lt.s32.totalorder (!%p273_p10), %s824_s21, 3 }
  0x10   : > { %s823_s17 = sshll.u32 (!%p273_p10), %s308_s16, 4  ;;  %s1003_s20 = sshll.u32 (!%p273_p10), %s1142_s27, 4 }
  0x11   : > { %s713_s23 = scalar_lea.hbm (!%p273_p10), %s1433_s7, %s1003_s20  ;;  %s310_s30 = scalar_lea.vmem (!%p273_p10), [#allocation3], %s823_s17 }
  0x12   : > { %s714_s8 = sshll.u32 (!%p273_p10), %s310_s30, 4  ;;  %s701_s12 = scalar_lea.sflag (!%p273_p10), [#allocation4], %s308_s16  ;;  %s715_s8 = int_to_ptr.vmem [resolvable:$true] %s714_s8 }
  0x13   : > { %s1092_s17 = scalar_lea.hbm (!%p273_p10), %s1433_s7, 32 }
  0x14   : > { %v340_v0 = vld [vmem:[%s1427_s1 + $0x40] sm:$0xff]  ;;  %vm401_vm0 = vcmask 1043456   ;;  %v856_v3 = vld [vmem:[%s1427_s1 + $0x30] sm:$0xf]  ;;  %v977_v4 = vld [vmem:[%s1427_s1 + $0x34] sm:$0xf0] }
  0x15   : > { %v377_v1 = vunpack.c.l.b16 %v340_v0  ;;  %v857_v6 = vor.u32 %v977_v4, %v856_v3  ;;  %v848_v7 = vld [vmem:[%s1427_s1 + $0x20] sm:$0xf]  ;;  %v975_v8 = vld [vmem:[%s1427_s1 + $0x24] sm:$0xf0]  ;;  %v985_v10 = vld [vmem:[%s1429_s3 + $0x38] sm:$0xff]  ;;  %s1444_s21 = smov (!%p312_p11, %s824_s21), 3  ;;  %v378_v13 = vunpack.c.h.b16 %v340_v0 }
  0x16   : > { %v849_v9 = vor.u32 %v975_v8, %v848_v7  ;;  %v840_v11 = vld [vmem:[%s1427_s1 + $0x10] sm:$0xf]  ;;  %v973_v12 = vld [vmem:[%s1427_s1 + $0x14] sm:$0xf0]  ;;  %574 = vmatpush.bf16.msra.mxu2 %v985_v10  ;;  %v832_v16 = vld [vmem:[%s1427_s1] sm:$0xf] }
  0x17   : > { %v387_v2 = vpack.c.b16 %v377_v1, %v377_v1  ;;  %v984_v14 = vld [vmem:[%s1429_s3 + $0x30] sm:$0xff]  ;;  %v841_v15 = vor.u32 %v973_v12, %v840_v11  ;;  %v971_v17 = vld [vmem:[%s1427_s1 + $0x4] sm:$0xf0]  ;;  %s825_s10 = sshll.u32 %s1444_s21, 2  ;;  %v388_v18 = vpack.c.b16 %v378_v13, %v378_v13  ;;  %v858_v23 = vld [vmem:[%s1427_s1 + $0x38] sm:$0xf0] }
  0x18   : > { %v983_v19 = vld [vmem:[%s1429_s3 + $0x28] sm:$0xff]  ;;  %v833_v20 = vor.u32 %v971_v17, %v832_v16  ;;  %s315_s18 = scalar_lea.vmem %s1426_s0, %s825_s10  ;;  %v976_v22 = vld [vmem:[%s1427_s1 + $0x34] sm:$0xf]  ;;  %v982_v24 = vld [vmem:[%s1429_s3 + $0x20] sm:$0xff]  ;;  %vm397_vm1 = vcmask 588800   ;;  %s716_s10 = sshll.u32 %s713_s23, 4  ;;  %s717_s10 = int_to_ptr.hbm [resolvable:$true] %s716_s10 }
  0x19   : > { %v403_v5 = vsel %vm401_vm0, %v387_v2, 0  ;;  %v406_v21 = vsel %vm401_vm0, %v388_v18, 0  ;;  %v969_v25 = vld [vmem:[%s315_s18] sm:$0xff]  ;;  %v861_v26 = vor.u32 %v976_v22, %v858_v23  ;;  %v850_v28 = vld [vmem:[%s1427_s1 + $0x28] sm:$0xf0]  ;;  %v981_v36 = vld [vmem:[%s1429_s3 + $0x18] sm:$0xff] }
  0x1a   : > { %411 = vmatpush.bf16.msra.mxu1 %v403_v5  ;;  %575 = vmatpush.bf16.msra.mxu2 %v984_v14  ;;  %v974_v27 = vld [vmem:[%s1427_s1 + $0x24] sm:$0xf]  ;;  %v972_v30 = vld [vmem:[%s1427_s1 + $0x14] sm:$0xf]  ;;  %v842_v31 = vld [vmem:[%s1427_s1 + $0x18] sm:$0xf0] }
  0x1b   : > { %v853_v29 = vor.u32 %v974_v27, %v850_v28  ;;  %v845_v32 = vor.u32 %v972_v30, %v842_v31  ;;  %v970_v33 = vld [vmem:[%s1427_s1 + $0x4] sm:$0xf]  ;;  %v834_v34 = vld [vmem:[%s1427_s1 + $0x8] sm:$0xf0]  ;;  %v993_v37 = vld [vmem:[%s1429_s3 + $0x78] sm:$0xff]  ;;  %s1086_s15 = sshra.s32 %s717_s10, 4  ;;  %s1087_s15 = int_to_ptr.hbm [resolvable:$true] %s1086_s15 }
  0x1c   : > { %v837_v35 = vor.u32 %v970_v33, %v834_v34  ;;  %588 = vmatpush.bf16.msra.mxu3 %v993_v37  ;;  %v980_v38 = vld [vmem:[%s1429_s3 + $0x10] sm:$0xff]  ;;  %v979_v40 = vld [vmem:[%s1429_s3 + $0x8] sm:$0xff]  ;;  %v978_v42 = vld [vmem:[%s1429_s3] sm:$0xff]  ;;  %s1088_s27 = scalar_lea.hbm %s1087_s15, 16  ;;  %p1093_p1 = scmp.lt.s32.totalorder %s1087_s15, %s1433_s7 }
  0x1d   : > { %v992_v39 = vld [vmem:[%s1429_s3 + $0x70] sm:$0xff]  ;;  %v991_v41 = vld [vmem:[%s1429_s3 + $0x68] sm:$0xff]  ;;  %v990_v43 = vld [vmem:[%s1429_s3 + $0x60] sm:$0xff]  ;;  %p1089_p12 = scmp.ne.s32.totalorder %s1087_s15, %s1088_s27  ;;  %p1094_p2 = scmp.lt.s32.totalorder %s1092_s17, %s1088_s27 }
  0x1e   : > { %412 = vmatpush.bf16.msra.mxu1 %v857_v6  ;;  %576 = vmatpush.bf16.msra.mxu2 %v983_v19  ;;  %v989_v44 = vld [vmem:[%s1429_s3 + $0x58] sm:$0xff]  ;;  %v988_v45 = vld [vmem:[%s1429_s3 + $0x50] sm:$0xff]  ;;  %v987_v46 = vld [vmem:[%s1429_s3 + $0x48] sm:$0xff] }
  0x1f   : > { %v986_v47 = vld [vmem:[%s1429_s3 + $0x40] sm:$0xff]  ;;  %v1002_v1 = vld [vmem:[%s1431_s5 + $0x38] sm:$0xff]  ;;  %v1001_v2 = vld [vmem:[%s1431_s5 + $0x30] sm:$0xff]  ;;  %p1090_p13 = pnand %p1089_p12, %p1234_p4  ;;  %p1095_p3 = por %p1094_p2, %p1093_p1 }
  0x20   : > { %589 = vmatpush.bf16.msra.mxu3 %v992_v39  ;;  %v341_v48 = vld [vmem:[%s1428_s2] sm:$0x3]  ;;  %684 = vmatpush.bf16.msra.mxu0 %v1002_v1  ;;  %v1000_v3 = vld [vmem:[%s1431_s5 + $0x28] sm:$0xff]  ;;  %v998_v5 = vld [vmem:[%s1431_s5 + $0x18] sm:$0xff] }
  0x21   : > { %v343_v50 = vperm.slane %v341_v48, 0  ;;  %v344_v58 = vperm.slane %v341_v48, 1  ;;  %v999_v4 = vld [vmem:[%s1431_s5 + $0x20] sm:$0xff]  ;;  %v997_v6 = vld [vmem:[%s1431_s5 + $0x10] sm:$0xff]  ;;  %v996_v7 = vld [vmem:[%s1431_s5 + $0x8] sm:$0xff]  ;;  %p1091_p0 = pneg %p1090_p13 }
  0x22   : > { %413 = vmatpush.bf16.msra.mxu1 %v849_v9  ;;  %577 = vmatpush.bf16.msra.mxu2 %v982_v24  ;;  %v995_v8 = vld [vmem:[%s1431_s5] sm:$0xff] }
  0x23   : > { %v1066_v10 = vld [vmem:[%s1430_s4] ss:$0 sm:$0xff]  ;;  %p1096_p5 = pnand %p1095_p3, %p1091_p0 }
  0x24   : > { %590 = vmatpush.bf16.msra.mxu3 %v991_v41  ;;  %685 = vmatpush.bf16.msra.mxu0 %v1001_v2  ;;  %v1067_v22 = vld [vmem:[%s1432_s6] ss:$0 sm:$0xff] }
  0x26   : > { %414 = vmatpush.bf16.msra.mxu1 %v841_v15  ;;  %578 = vmatpush.bf16.msra.mxu2 %v981_v36 }
  0x28   : > { %591 = vmatpush.bf16.msra.mxu3 %v990_v43  ;;  %686 = vmatpush.bf16.msra.mxu0 %v1000_v3 }
  0x2a   : > { %415 = vmatpush.bf16.msra.mxu1 %v833_v20  ;;  %579 = vmatpush.bf16.msra.mxu2 %v980_v38 }
  0x2c   : > { %592 = vmatpush.bf16.msra.mxu3 %v989_v44  ;;  %687 = vmatpush.bf16.msra.mxu0 %v999_v4 }
  0x2d   : > { %862 = vmatmul.msk.bf16.vlgmr.msra.gmra.mxu1 %vm397_vm1, %v969_v25 }
  0x2e   : > { %425 = vmatpush.bf16.msrb.mxu1 %v406_v21  ;;  %580 = vmatpush.bf16.msra.mxu2 %v979_v40 }
  0x30   : > { %593 = vmatpush.bf16.msra.mxu3 %v988_v45  ;;  %688 = vmatpush.bf16.msra.mxu0 %v998_v5 }
  0x32   : > { %426 = vmatpush.bf16.msrb.mxu1 %v861_v26  ;;  %581 = vmatpush.bf16.msra.mxu2 %v978_v42 }
  0x34   : > { %594 = vmatpush.bf16.msra.mxu3 %v987_v46  ;;  %689 = vmatpush.bf16.msra.mxu0 %v997_v6 }
  0x36   : > { %427 = vmatpush.bf16.msrb.mxu1 %v853_v29 }
  0x38   : > { %595 = vmatpush.bf16.msra.mxu3 %v986_v47  ;;  %690 = vmatpush.bf16.msra.mxu0 %v996_v7 }
  0x3a   : > { %428 = vmatpush.bf16.msrb.mxu1 %v845_v32 }
  0x3c   : > { %691 = vmatpush.bf16.msra.mxu0 %v995_v8 }
  0x3e   : > { %429 = vmatpush.bf16.msrb.mxu1 %v837_v35 }
  0x41   : > { %863 = vmatmul.msk.bf16.vlgmr.msrb.gmra.mxu1 %vm397_vm1, %v969_v25 }
  0xaa   : > { %v417_v49 = vpop.f32.mrf.mxu1 }
  0xab   : > { %v418_v51 = vadd.f32 %v417_v49, %v343_v50 }
  0xad   : > { %v436_v54 = vmax.f32 %v418_v51, 0.0 }
  0xb2   : > { %v419_v52 = vpop.f32.mrf.mxu1 }
  0xb3   : > { %v420_v53 = vadd.f32 %v419_v52, %v343_v50 }
  0xb5   : > { %v438_v55 = vmax.f32 %v420_v53, 0.0 }
  0xb7   : > { %v440_v56 = vpack.c.bf16 %v438_v55, %v436_v54 }
  0xb9   : > { %582 = vmatmul.bf16.vlgmr.msra.gmra.mxu2 %v440_v56 }
  0xbe   : > { %v431_v57 = vpop.f32.mrf.mxu1 }
  0xbf   : > { %v432_v59 = vadd.f32 %v431_v57, %v344_v58 }
  0xc1   : > { %v437_v62 = vmax.f32 %v432_v59, 0.0 }
  0xc6   : > { %v433_v60 = vpop.f32.mrf.mxu1 }
  0xc7   : > { %v434_v61 = vadd.f32 %v433_v60, %v344_v58 }
  0xc9   : > { %v439_v63 = vmax.f32 %v434_v61, 0.0 }
  0xcb   : > { %v441_v0 = vpack.c.bf16 %v439_v63, %v437_v62 }
  0xcd   : > { %596 = vmatmul.bf16.vlgmr.msra.gmra.mxu3 %v441_v0 }
 0x13c   : > { %v583_v9 = vpop.f32.mrf.mxu2 }
 0x13d   : > { %v584_v12 = vadd.f32 %v1066_v10, %v583_v9 }
 0x144   : > { %v585_v13 = vpop.f32.mrf.mxu2 }
 0x145   : > { %v586_v15 = vadd.f32 %v1066_v10, %v585_v13 }
 0x150   : > { %v597_v11 = vpop.f32.mrf.mxu3 }
 0x151   : > { %v598_v14 = vadd.f32 %v597_v11, %v584_v12 }
 0x153   : > { %1068 = vtanh.f32 %v598_v14 }
 0x158   : > { %v599_v16 = vpop.f32.mrf.mxu3 }
 0x159   : > { %v600_v17 = vadd.f32 %v599_v16, %v586_v15  ;;  %v1069_v18 = vpop.eup %1068 }
 0x15b   : > { %1070 = vtanh.f32 %v600_v17 }
 0x161   : > { %v1071_v19 = vpop.eup %1070 }
 0x162   : > { %v1007_v20 = vpack.c.bf16 %v1071_v19, %v1069_v18 }
 0x164   : > { %1008 = vst [vmem:[#allocation2] sm:$0xff] %v1007_v20  }
 0x16b   : > { %v994_v21 = vld [vmem:[#allocation2] sm:$0xff] }
 0x16c   : > { %692 = vmatmul.bf16.vlgmr.msra.gmra.mxu0 %v994_v21 }
 0x1e9   : > { %v693_v23 = vpop.f32.mrf.mxu0 }
 0x1ea   : > { %v694_v24 = vadd.f32 %v1067_v22, %v693_v23 }
 0x1ec   : > { %698 = vst [vmem:[%s310_s30] sm:$0xff] %v694_v24 }
 0x1f1   : > { %v695_v25 = vpop.f32.mrf.mxu0 }
 0x1f2   : > { %v696_v26 = vadd.f32 %v1067_v22, %v695_v25 }
 0x1f4   : > { %699 = vst [vmem:[%s310_s30 + $0x8] sm:$0xff] %v696_v26 }
 0x1f5   : > { %1099 = shalt.err (!%p1096_p5)
}
 0x1f6   : > { %s1152_s16 = smov 128   ;;  %s1153_s21 = smov 8  }
 0x1f7   : > { %1009 = dma.vmem_to_hbm [thread:$0]  (%p1234_p4), %s715_s8, 256, %s717_s10, %s701_s12, %s1152_s16, %s1152_s16, %s1153_s21  }
 0x1f8 PF: > { %p1015_p6 = scmp.ge.s32.totalorder %s1150_s29, 2  ;;  %s731_s23 = sand.u32 1, %s1130_s24  }
 0x1f9   : > { %s732_s30 = scalar_lea.sflag [#allocation4], %s731_s23 }
 0x1fa   : > { %p1012_p7 = pnand %p1015_p6, %p1241_p8 }
 0x1fc   : > { %p1013_p9 = pneg %p1012_p7 }
 0x1fe   : > { %1125 = dma.done.wait (%p1013_p9), %s732_s30, 256  }
 0x1ff   : > { %1127 = vsyncadd (%p1013_p9), %s732_s30, 4294967040  ;;  %s20_s29 = sadd.s32 1, %s1150_s29   ;;  %s1436_s24 = smov %s1134_s25 }
 0x200   : > { %p17_p10 = scmp.ge.s32.totalorder %s20_s29, 4   ;;  %s1437_s25 = smov %s1138_s26 }
 0x201   : > { %s1438_s26 = smov %s1247_s14  ;;  %s1439_s27 = smov %s1146_s28 }
 0x202   : > { %s1440_s28 = smov %s1442_s9  ;;  %19 = sbr.rel (!%p17_p10) target bundleno = 4 (0x4), region = 93 }
 0x207   :  { %738 = vsyncpa [#allocation4], 1 }
 0x208   :  { %740 = vsyncpa [#allocation4 + $0x1], 1 }

</bundles_post_ra>
